<compile_context>
chip_gen: v7x
topology: tpu7x:2x2x1
jax: 0.10.0
libtpu: 0.0.40
codegen_flags: <defaults>
</compile_context>

<pallas_src>
import functools

import jax
import jax.numpy as jnp
from jax.experimental import pallas as pl
from jax.experimental.pallas import tpu as pltpu


# ----------------------------------------------------------------------------
# small helpers
# ----------------------------------------------------------------------------
def _round_up(x, m):
    return ((x + m - 1) // m) * m


def _pad2(x, rows, cols):
    return jnp.pad(x, ((0, rows - x.shape[0]), (0, cols - x.shape[1])))


def _node_tiling(n, tm_max=512, tk_max=2048):
    """Single padded extent per node type + row (dst) / reduction (src) tiles.

    Tiles are power-of-two multiples of 128 so one padded extent is a multiple
    of both; A/X are padded once in model_forward and reused by all layers.
    """
    n128 = _round_up(n, 128)
    p2 = 128
    while p2 < n128:
        p2 *= 2
    tk = min(tk_max, p2)
    tm = min(tm_max, p2)
    # keep >= 2 row tiles when the node dim allows it so the "parallel" row
    # axis actually shards across v7x's two TensorCores.
    if n128 > 128 and _round_up(n128, tm) // tm < 2:
        tm = max(128, tm // 2)
    n_pad = _round_up(n, max(tm, tk))
    return n_pad, tm, tk


# ----------------------------------------------------------------------------
# Pallas kernels
# ----------------------------------------------------------------------------
def _sage_layer_kernel(a_ref, dinv_ref, xsrc_ref, xdst_ref, w_ref, b_ref,
                       o_ref, acc_ref, cat_ref, *, apply_relu, f_src_pad):
    """Grid = (row_tiles, k_tiles).  acc (f32, VMEM) holds A @ Xsrc."""
    k = pl.program_id(1)

    @pl.when(k == 0)
    def _():
        acc_ref[...] = jnp.zeros_like(acc_ref)

    # bf16 x bf16 -> f32 accumulate on the MXU (counts adjacency, exact).
    acc_ref[...] += jnp.dot(a_ref[...], xsrc_ref[...],
                            preferred_element_type=jnp.float32)

    @pl.when(k == pl.num_programs(1) - 1)
    def _():
        # mean normalization in f32, then fused [agg | xdst] @ [Wl; Wr].
        cat_ref[:, :f_src_pad] = (acc_ref[...] * dinv_ref[...]).astype(
            jnp.bfloat16)
        cat_ref[:, f_src_pad:] = xdst_ref[...]
        out = jnp.dot(cat_ref[...], w_ref[...],
                      preferred_element_type=jnp.float32)
        out = out + b_ref[...]          # (1, H_pad) broadcasts over rows, f32
        if apply_relu:
            out = jnp.maximum(out, 0.0)
        o_ref[...] = out.astype(o_ref.dtype)


def sage_layer(a_p, dinv_p, xs_p, xd_p, w_l, w_r, b, *, apply_relu, tm, tk):
    """One SAGEConv on pre-padded bf16 inputs; returns padded bf16 output.

    out[dst] = ((A @ x_src) * 1/deg) @ Wl + x_dst @ Wr + b
    """
    n_dst_pad, n_src_pad = a_p.shape
    hidden = w_l.shape[1]
    h_pad = _round_up(hidden, 128)
    f_src_pad = _round_up(w_l.shape[0], 128)
    f_dst_pad = _round_up(w_r.shape[0], 128)
    assert xs_p.shape == (n_src_pad, f_src_pad)
    assert xd_p.shape == (n_dst_pad, f_dst_pad)
    assert n_dst_pad % tm == 0 and n_src_pad % tk == 0

    # stacked [Wl; Wr] -> one fused epilogue matmul (fills the 256-deep MXU).
    w_cat = jnp.zeros((f_src_pad + f_dst_pad, h_pad), jnp.float32)
    w_cat = w_cat.at[:w_l.shape[0], :hidden].set(w_l)
    w_cat = w_cat.at[f_src_pad:f_src_pad + w_r.shape[0], :hidden].set(w_r)
    w_cat = w_cat.astype(jnp.bfloat16)
    b_p = jnp.pad(b, (0, h_pad - hidden)).reshape(1, h_pad).astype(jnp.float32)

    grid = (n_dst_pad // tm, n_src_pad // tk)
    kernel = functools.partial(_sage_layer_kernel, apply_relu=apply_relu,
                               f_src_pad=f_src_pad)

    # TODO(synk): replace the dense A stream with a CSR / scalar-prefetch
    # block-skipping gather kernel (and int8/fp8 A) for large sparse graphs.
    out = pl.pallas_call(
        kernel,
        out_shape=jax.ShapeDtypeStruct((n_dst_pad, h_pad), jnp.bfloat16),
        grid_spec=pltpu.PrefetchScalarGridSpec(
            num_scalar_prefetch=0,
            grid=grid,
            in_specs=[
                pl.BlockSpec((tm, tk), lambda i, k: (i, k)),            # A
                pl.BlockSpec((tm, 1), lambda i, k: (i, 0)),             # 1/deg
                pl.BlockSpec((tk, f_src_pad), lambda i, k: (k, 0)),     # Xsrc
                pl.BlockSpec((tm, f_dst_pad), lambda i, k: (i, 0)),     # Xdst
                pl.BlockSpec((f_src_pad + f_dst_pad, h_pad),
                             lambda i, k: (0, 0)),                      # [Wl;Wr]
                pl.BlockSpec((1, h_pad), lambda i, k: (0, 0)),          # bias
            ],
            out_specs=pl.BlockSpec((tm, h_pad), lambda i, k: (i, 0)),
            scratch_shapes=[
                pltpu.VMEM((tm, f_src_pad), jnp.float32),               # acc
                pltpu.VMEM((tm, f_src_pad + f_dst_pad), jnp.bfloat16),  # cat
            ],
        ),
        compiler_params=pltpu.CompilerParams(
            dimension_semantics=("parallel", "arbitrary"),
            vmem_limit_bytes=48 * 1024 * 1024,
        ),
    )(a_p, dinv_p, xs_p, xd_p, w_cat, b_p)

    # keep node-row and hidden-lane padding: padded rows are never read
    # (A's padded src columns are zero; decoder gathers only real indices),
    # padded lanes are exactly zero, so the next layer / decoder stay
    # lane-dense with no re-pad/re-cast passes.
    return out


def _inner_product_kernel(xs_ref, xd_ref, o_ref):
    # inputs (H_pad, TE) bf16: f32 product + sublane reduce -> lane-dense store.
    prod = xs_ref[...].astype(jnp.float32) * xd_ref[...].astype(jnp.float32)
    o_ref[...] = jnp.sum(prod, axis=0, keepdims=True)


def inner_product_decoder(x_src_g, x_dst_g, *, te_max=2048):
    """(x_src * x_dst).sum(-1) for pre-gathered (padded bf16) embeddings."""
    e, h = x_src_g.shape
    te = 128
    while te < min(te_max, _round_up(e, 128)):
        te *= 2
    e_pad = _round_up(e, te)

    # edge axis on lanes => unmasked, lane-dense stores. bf16 halves HBM reads.
    # TODO(synk): fold the endpoint gather into the kernel with scalar-prefetch
    # indices for very large edge counts.
    xs = jnp.pad(x_src_g, ((0, e_pad - e), (0, 0))).T   # (h, e_pad) bf16
    xd = jnp.pad(x_dst_g, ((0, e_pad - e), (0, 0))).T

    out = pl.pallas_call(
        _inner_product_kernel,
        out_shape=jax.ShapeDtypeStruct((1, e_pad), jnp.float32),
        grid_spec=pltpu.PrefetchScalarGridSpec(
            num_scalar_prefetch=0,
            grid=(e_pad // te,),
            in_specs=[pl.BlockSpec((h, te), lambda j: (0, j)),
                      pl.BlockSpec((h, te), lambda j: (0, j))],
            out_specs=pl.BlockSpec((1, te), lambda j: (0, j)),
        ),
        compiler_params=pltpu.CompilerParams(
            dimension_semantics=("parallel",)),
    )(xs, xd)
    return out[0, :e]


# ----------------------------------------------------------------------------
# Model glue (plain JAX): adjacency build, parameter init, hetero wiring
# ----------------------------------------------------------------------------
def glorot(key, shape):
    fan_in, fan_out = shape[0], shape[1]
    limit = (6.0 / (fan_in + fan_out)) ** 0.5
    return jax.random.uniform(key, shape, jnp.float32, -limit, limit)


def init_params(key, f_user, f_business, hidden):
    """Three hetero SAGE layers; one conv per edge type per layer.

    'u2b' updates business nodes (src=user, dst=business); 'b2u' the reverse.
    Weights are stored already transposed: (in_features, hidden).
    """
    params = []
    dims = [(f_user, f_business), (hidden, hidden), (hidden, hidden)]
    for layer, (fu, fb) in enumerate(dims):
        keys = jax.random.split(jax.random.fold_in(key, layer), 4)
        params.append({
            "u2b": {  # messages user -> business
                "w_l": glorot(keys[0], (fu, hidden)),
                "w_r": glorot(keys[1], (fb, hidden)),
                "b": jnp.zeros((hidden,), jnp.float32),
            },
            "b2u": {  # messages business -> user (reverse edges)
                "w_l": glorot(keys[2], (fb, hidden)),
                "w_r": glorot(keys[3], (fu, hidden)),
                "b": jnp.zeros((hidden,), jnp.float32),
            },
        })
    return params


def model_forward(params, x_user, x_business, edge_index_u2b, edge_label_index):
    n_u, n_b = x_user.shape[0], x_business.shape[0]
    n_u_pad, tm_u, tk_u = _node_tiling(n_u)
    n_b_pad, tm_b, tk_b = _node_tiling(n_b)

    # counts adjacency (exact small ints -> lossless bf16) + f32 inverse degree.
    # ToUndirected(): reverse adjacency is the transpose of the counts matrix.
    src, dst = edge_index_u2b[0], edge_index_u2b[1]
    a_b = jnp.zeros((n_b, n_u), jnp.float32).at[dst, src].add(1.0)  # dst=business
    a_u = a_b.T                                                     # dst=user
    dinv_b = 1.0 / jnp.maximum(a_b.sum(axis=1, keepdims=True), 1.0)
    dinv_u = 1.0 / jnp.maximum(a_u.sum(axis=1, keepdims=True), 1.0)

    # pad + cast exactly once; reused by all three layers.
    a_b_p = _pad2(a_b, n_b_pad, n_u_pad).astype(jnp.bfloat16)
    a_u_p = _pad2(a_u, n_u_pad, n_b_pad).astype(jnp.bfloat16)
    dinv_b_p = _pad2(dinv_b, n_b_pad, 1)
    dinv_u_p = _pad2(dinv_u, n_u_pad, 1)

    f_u_pad = _round_up(x_user.shape[1], 128)
    f_b_pad = _round_up(x_business.shape[1], 128)
    xu = _pad2(x_user, n_u_pad, f_u_pad).astype(jnp.bfloat16)
    xb = _pad2(x_business, n_b_pad, f_b_pad).astype(jnp.bfloat16)

    for layer, p in enumerate(params):
        relu = layer < 2
        new_xu = sage_layer(a_u_p, dinv_u_p, xb, xu,
                            p["b2u"]["w_l"], p["b2u"]["w_r"], p["b2u"]["b"],
                            apply_relu=relu, tm=tm_u, tk=tk_b)
        new_xb = sage_layer(a_b_p, dinv_b_p, xu, xb,
                            p["u2b"]["w_l"], p["u2b"]["w_r"], p["u2b"]["b"],
                            apply_relu=relu, tm=tm_b, tk=tk_u)
        xu, xb = new_xu, new_xb

    # InnerProductDecoder: endpoint gather stays in XLA, dot product in Pallas.
    x_src = xu[edge_label_index[0]]
    x_dst = xb[edge_label_index[1]]
    return inner_product_decoder(x_src, x_dst)


# pure-JAX reference (mirrors the kernel's bf16 rounding of A/X/W, f32 accum,
# f32 1/deg scaling, bf16 activation storage between layers)
def _ref_forward(params, x_user, x_business, edge_index_u2b, edge_label_index):
    def bf(x):
        return x.astype(jnp.bfloat16).astype(jnp.float32)

    n_u, n_b = x_user.shape[0], x_business.shape[0]
    src, dst = edge_index_u2b[0], edge_index_u2b[1]
    a_b = jnp.zeros((n_b, n_u), jnp.float32).at[dst, src].add(1.0)
    a_u = a_b.T
    dinv_b = 1.0 / jnp.maximum(a_b.sum(axis=1, keepdims=True), 1.0)
    dinv_u = 1.0 / jnp.maximum(a_u.sum(axis=1, keepdims=True), 1.0)

    def conv(a, dinv, xs, xd, p, relu):
        agg = (bf(a) @ bf(xs)) * dinv
        out = bf(agg) @ bf(p["w_l"]) + bf(xd) @ bf(p["w_r"]) + p["b"]
        out = jnp.maximum(out, 0.0) if relu else out
        return bf(out)   # kernel stores bf16 activations between layers

    xu, xb = x_user, x_business
    for layer, p in enumerate(params):
        relu = layer < 2
        new_xu = conv(a_u, dinv_u, xb, xu, p["b2u"], relu)
        new_xb = conv(a_b, dinv_b, xu, xb, p["u2b"], relu)
        xu, xb = new_xu, new_xb
    return jnp.sum(xu[edge_label_index[0]] * xb[edge_label_index[1]], axis=-1)


# ----------------------------------------------------------------------------
if __name__ == "__main__":
    key = jax.random.PRNGKey(0)
    k_xu, k_xb, k_e, k_el, k_p = jax.random.split(key, 5)

    N_USER, N_BUSINESS = 16, 32
    F_USER, F_BUSINESS = 16, 24
    HIDDEN = 32
    N_EDGES, N_LABEL_EDGES = 64, 8

    x_user = jax.random.normal(k_xu, (N_USER, F_USER), jnp.float32)
    x_business = jax.random.normal(k_xb, (N_BUSINESS, F_BUSINESS), jnp.float32)
    edge_index = jnp.stack([
        jax.random.randint(jax.random.fold_in(k_e, 0), (N_EDGES,), 0, N_USER),
        jax.random.randint(jax.random.fold_in(k_e, 1), (N_EDGES,), 0, N_BUSINESS),
    ], axis=0)
    edge_label_index = jnp.stack([
        jax.random.randint(jax.random.fold_in(k_el, 0), (N_LABEL_EDGES,), 0, N_USER),
        jax.random.randint(jax.random.fold_in(k_el, 1), (N_LABEL_EDGES,), 0, N_BUSINESS),
    ], axis=0)

    params = init_params(k_p, F_USER, F_BUSINESS, HIDDEN)

    out = model_forward(params, x_user, x_business, edge_index, edge_label_index)
    jax.block_until_ready(out)
    assert out.shape == (N_LABEL_EDGES,)
    assert bool(jnp.all(jnp.isfinite(out)))

    ref = _ref_forward(params, x_user, x_business, edge_index, edge_label_index)
    assert jnp.allclose(out, ref, rtol=5e-2, atol=5e-2), (out, ref)

    print("KERNEL_OK")
</pallas_src>

<mosaic_0001>
module attributes {stable_mosaic.version = 11 : i64} {
  func.func @_sage_layer_kernel(%arg0: i32, %arg1: i32, %arg2: memref<128x128xbf16, #tpu.memory_space<vmem>>, %arg3: memref<128x1xf32, #tpu.memory_space<vmem>>, %arg4: memref<128x128xbf16, #tpu.memory_space<vmem>>, %arg5: memref<128x128xbf16, #tpu.memory_space<vmem>>, %arg6: memref<256x128xbf16, #tpu.memory_space<vmem>>, %arg7: memref<1x128xf32, #tpu.memory_space<vmem>>, %arg8: memref<128x128xbf16, #tpu.memory_space<vmem>>, %arg9: memref<128x128xf32, #tpu.memory_space<vmem>>, %arg10: memref<128x256xbf16, #tpu.memory_space<vmem>>) attributes {dimension_semantics = [#tpu.dimension_semantics<parallel>, #tpu.dimension_semantics<arbitrary>], iteration_bounds = array<i64: 1, 1>, scalar_prefetch = 0 : i64, scratch_operands = 2 : i64, tpu.core_type = #tpu.core_type<tc>, window_params = [{transform_indices = @transform_0, window_bounds = array<i64: 128, 128>}, {transform_indices = @transform_1, window_bounds = array<i64: 128, 1>}, {transform_indices = @transform_2, window_bounds = array<i64: 128, 128>}, {transform_indices = @transform_3, window_bounds = array<i64: 128, 128>}, {pipeline_mode = #tpu.pipeline_mode<synchronous>, transform_indices = @transform_4, window_bounds = array<i64: 256, 128>}, {pipeline_mode = #tpu.pipeline_mode<synchronous>, transform_indices = @transform_5, window_bounds = array<i64: 1, 128>}, {transform_indices = @transform_6, window_bounds = array<i64: 128, 128>}]} {
    %c0_i32 = arith.constant 0 : i32
    %0 = arith.cmpi eq, %arg1, %c0_i32 : i32
    %1 = arith.extui %0 : i1 to i32
    %c0_i32_0 = arith.constant 0 : i32
    %2 = arith.cmpi ne, %1, %c0_i32_0 : i32
    scf.if %2 {
      %cst_10 = arith.constant 0.000000e+00 : f32
      %12 = vector.broadcast %cst_10 : f32 to vector<128x128xf32>
      %c0_11 = arith.constant 0 : index
      %c0_12 = arith.constant 0 : index
      %13 = vector.load %arg9[%c0_11, %c0_12] : memref<128x128xf32, #tpu.memory_space<vmem>>, vector<128x128xf32>
      tpu.vector_store %arg9[%c0_11, %c0_12], %12 {strides = array<i32>} : memref<128x128xf32, #tpu.memory_space<vmem>>, vector<128x128xf32>,
    } else {
    }
    %c0 = arith.constant 0 : index
    %c0_1 = arith.constant 0 : index
    %3 = vector.load %arg9[%c0, %c0_1] : memref<128x128xf32, #tpu.memory_space<vmem>>, vector<128x128xf32>
    %c0_2 = arith.constant 0 : index
    %c0_3 = arith.constant 0 : index
    %4 = vector.load %arg2[%c0_2, %c0_3] : memref<128x128xbf16, #tpu.memory_space<vmem>>, vector<128x128xbf16>
    %c0_4 = arith.constant 0 : index
    %c0_5 = arith.constant 0 : index
    %5 = vector.load %arg4[%c0_4, %c0_5] : memref<128x128xbf16, #tpu.memory_space<vmem>>, vector<128x128xbf16>
    %cst = arith.constant dense<0.000000e+00> : vector<128x128xf32>
    %6 = tpu.matmul %4, %5, %cst {dimension_numbers = #tpu.dot_dimension_numbers<[1], [0], [0], [1], [0, 0, 1, 1], [], []>} : vector<128x128xbf16>, vector<128x128xbf16>, vector<128x128xf32> -> vector<128x128xf32>
    %7 = arith.addf %3, %6 : vector<128x128xf32>
    %c0_6 = arith.constant 0 : index
    %c0_7 = arith.constant 0 : index
    %8 = vector.load %arg9[%c0_6, %c0_7] : memref<128x128xf32, #tpu.memory_space<vmem>>, vector<128x128xf32>
    tpu.vector_store %arg9[%c0_6, %c0_7], %7 {strides = array<i32>} : memref<128x128xf32, #tpu.memory_space<vmem>>, vector<128x128xf32>,
    %c0_i32_8 = arith.constant 0 : i32
    %9 = arith.cmpi eq, %arg1, %c0_i32_8 : i32
    %10 = arith.extui %9 : i1 to i32
    %c0_i32_9 = arith.constant 0 : i32
    %11 = arith.cmpi ne, %10, %c0_i32_9 : i32
    scf.if %11 {
      %c0_10 = arith.constant 0 : index
      %c0_11 = arith.constant 0 : index
      %12 = vector.load %arg9[%c0_10, %c0_11] : memref<128x128xf32, #tpu.memory_space<vmem>>, vector<128x128xf32>
      %c0_12 = arith.constant 0 : index
      %c0_13 = arith.constant 0 : index
      %13 = vector.load %arg3[%c0_12, %c0_13] : memref<128x1xf32, #tpu.memory_space<vmem>>, vector<128x1xf32>
      %14 = vector.broadcast %13 : vector<128x1xf32> to vector<128x128xf32>
      %15 = arith.mulf %12, %14 : vector<128x128xf32>
      %16 = arith.truncf %15 : vector<128x128xf32> to vector<128x128xbf16>
      %c0_14 = arith.constant 0 : index
      %c0_15 = arith.constant 0 : index
      %17 = vector.load %arg10[%c0_14, %c0_15] : memref<128x256xbf16, #tpu.memory_space<vmem>>, vector<128x128xbf16>
      tpu.vector_store %arg10[%c0_14, %c0_15], %16 {strides = array<i32>} : memref<128x256xbf16, #tpu.memory_space<vmem>>, vector<128x128xbf16>,
      %c0_16 = arith.constant 0 : index
      %c0_17 = arith.constant 0 : index
      %18 = vector.load %arg5[%c0_16, %c0_17] : memref<128x128xbf16, #tpu.memory_space<vmem>>, vector<128x128xbf16>
      %c0_18 = arith.constant 0 : index
      %c128 = arith.constant 128 : index
      %19 = vector.load %arg10[%c0_18, %c128] : memref<128x256xbf16, #tpu.memory_space<vmem>>, vector<128x128xbf16>
      tpu.vector_store %arg10[%c0_18, %c128], %18 {strides = array<i32>} : memref<128x256xbf16, #tpu.memory_space<vmem>>, vector<128x128xbf16>,
      %c0_19 = arith.constant 0 : index
      %c0_20 = arith.constant 0 : index
      %20 = vector.load %arg10[%c0_19, %c0_20] : memref<128x256xbf16, #tpu.memory_space<vmem>>, vector<128x256xbf16>
      %c0_21 = arith.constant 0 : index
      %c0_22 = arith.constant 0 : index
      %21 = vector.load %arg6[%c0_21, %c0_22] : memref<256x128xbf16, #tpu.memory_space<vmem>>, vector<256x128xbf16>
      %cst_23 = arith.constant dense<0.000000e+00> : vector<128x128xf32>
      %22 = tpu.matmul %20, %21, %cst_23 {dimension_numbers = #tpu.dot_dimension_numbers<[1], [0], [0], [1], [0, 0, 1, 1], [], []>} : vector<128x256xbf16>, vector<256x128xbf16>, vector<128x128xf32> -> vector<128x128xf32>
      %c0_24 = arith.constant 0 : index
      %c0_25 = arith.constant 0 : index
      %23 = vector.load %arg7[%c0_24, %c0_25] : memref<1x128xf32, #tpu.memory_space<vmem>>, vector<1x128xf32>
      %24 = vector.broadcast %23 : vector<1x128xf32> to vector<128x128xf32>
      %25 = arith.addf %22, %24 : vector<128x128xf32>
      %cst_26 = arith.constant 0.000000e+00 : f32
      %26 = vector.broadcast %cst_26 : f32 to vector<128x128xf32>
      %27 = arith.maximumf %25, %26 : vector<128x128xf32>
      %28 = arith.truncf %27 : vector<128x128xf32> to vector<128x128xbf16>
      %c0_27 = arith.constant 0 : index
      %c0_28 = arith.constant 0 : index
      %29 = vector.load %arg8[%c0_27, %c0_28] : memref<128x128xbf16, #tpu.memory_space<vmem>>, vector<128x128xbf16>
      tpu.vector_store %arg8[%c0_27, %c0_28], %28 {strides = array<i32>} : memref<128x128xbf16, #tpu.memory_space<vmem>>, vector<128x128xbf16>,
    } else {
    }
    return
  }
  func.func @transform_0(%arg0: i32, %arg1: i32) -> (i32, i32) {
    %c0_i32 = arith.constant 0 : i32
    return %arg0, %arg1 : i32, i32
  }
  func.func @transform_1(%arg0: i32, %arg1: i32) -> (i32, i32) {
    %c0_i32 = arith.constant 0 : i32
    %c0_i32_0 = arith.constant 0 : i32
    return %arg0, %c0_i32 : i32, i32
  }
  func.func @transform_2(%arg0: i32, %arg1: i32) -> (i32, i32) {
    %c0_i32 = arith.constant 0 : i32
    %c0_i32_0 = arith.constant 0 : i32
    return %arg1, %c0_i32 : i32, i32
  }
  func.func @transform_3(%arg0: i32, %arg1: i32) -> (i32, i32) {
    %c0_i32 = arith.constant 0 : i32
    %c0_i32_0 = arith.constant 0 : i32
    return %arg0, %c0_i32 : i32, i32
  }
  func.func @transform_4(%arg0: i32, %arg1: i32) -> (i32, i32) {
    %c0_i32 = arith.constant 0 : i32
    %c0_i32_0 = arith.constant 0 : i32
    %c0_i32_1 = arith.constant 0 : i32
    return %c0_i32, %c0_i32_0 : i32, i32
  }
  func.func @transform_5(%arg0: i32, %arg1: i32) -> (i32, i32) {
    %c0_i32 = arith.constant 0 : i32
    %c0_i32_0 = arith.constant 0 : i32
    %c0_i32_1 = arith.constant 0 : i32
    return %c0_i32, %c0_i32_0 : i32, i32
  }
  func.func @transform_6(%arg0: i32, %arg1: i32) -> (i32, i32) {
    %c0_i32 = arith.constant 0 : i32
    %c0_i32_0 = arith.constant 0 : i32
    return %arg0, %c0_i32 : i32, i32
  }
}

</mosaic_0001>

<bundles_post_ra>
// kernel: tpu_custom_call.1
= control target key start
LH: loop header
LB: loop body
LE: loop exit
PB: predicated region body
PF: predicated region fallthrough
CT: control target
= control target key end

     0   :  { %11 = vsyncpa [#allocation5], 0  ;;  %s1557_s0 = inlined_call_operand.hbm [shape: bf16[128,128], index: 0, kind: input, shape index: {}]   ;;  %s1558_s1 = inlined_call_operand.vmem [shape: f32[128,1], index: 1, kind: input, shape index: {}]   ;;  %s1559_s2 = inlined_call_operand.hbm [shape: bf16[128,128], index: 2, kind: input, shape index: {}]   ;;  %s1560_s3 = inlined_call_operand.hbm [shape: bf16[128,128], index: 3, kind: input, shape index: {}]   ;;  %s1561_s4 = inlined_call_operand.vmem [shape: bf16[256,128], index: 4, kind: input, shape index: {}]   ;;  %s1562_s5 = inlined_call_operand.vmem [shape: f32[1,128], index: 5, kind: input, shape index: {}]   ;;  %s1563_s6 = inlined_call_operand.hbm [shape: bf16[128,128], index: 6, kind: output, shape index: {}]  }
   0x1   :  { %12 = vsyncpa [#allocation8], 0 }
   0x2   :  { %13 = vsyncpa [#allocation6], 0  ;;  %s1331_s21 = smov [#allocation7]   ;;  %s1332_s23 = smov [#allocation4]  }
   0x3   :  { %s33_s22 = sshll.u32 %s1331_s21, 4  ;;  %s19_s24 = sshll.u32 %s1332_s23, 4  ;;  %s34_s22 = int_to_ptr.vmem [resolvable:$true] %s33_s22  ;;  %s1373_s24 = int_to_ptr.vmem [resolvable:$true] %s19_s24 }
   0x4   :  { %s1237_s27 = scalar_lea.hbm %s1559_s2, 1024 }
   0x5   :  { %p1238_p0 = scmp.ne.s32.totalorder %s1559_s2, %s1237_s27  ;;  %p1241_p1 = scmp.lt.u32.totalorder %s1237_s27, %s1559_s2 }
   0x7   :  { %p1243_p2 = pnand %p1241_p1, %p1238_p0 }
   0x9   :  { %1246 = shalt.err (!%p1243_p2)
}
   0xa   :  { %s1247_s8 = scalar_lea.vmem %s34_s22, 1024  ;;  %p1252_p4 = scmp.lt.s32.totalorder %s34_s22, %s34_s22 }
   0xb   :  { %p1248_p3 = scmp.ne.s32.totalorder %s34_s22, %s1247_s8  ;;  %p1253_p5 = scmp.lt.s32.totalorder %s1247_s8, %s1247_s8 }
   0xd   :  { %p1254_p6 = por %p1253_p5, %p1252_p4 }
   0xf   :  { %p1255_p7 = pnand %p1254_p6, %p1248_p3 }
  0x11   :  { %1258 = shalt.err (!%p1255_p7)
}
  0x12   :  { %s1333_s9 = smov 64   ;;  %s1334_s10 = smov 4  }
  0x13   :  { %39 = dma.hbm_to_vmem [thread:$0]  %s1559_s2, 1024, %s34_s22, [#allocation8], %s1333_s9, %s1333_s9, %s1334_s10  }
  0x14   :  { %s1259_s15 = scalar_lea.hbm %s1557_s0, 1024 }
  0x15   :  { %p1260_p8 = scmp.ne.s32.totalorder %s1557_s0, %s1259_s15  ;;  %p1263_p9 = scmp.lt.u32.totalorder %s1259_s15, %s1557_s0 }
  0x17   :  { %p1265_p10 = pnand %p1263_p9, %p1260_p8 }
  0x19   :  { %1268 = shalt.err (!%p1265_p10)
}
  0x1a   :  { %s1269_s20 = scalar_lea.vmem %s1373_s24, 1024  ;;  %p1274_p12 = scmp.lt.s32.totalorder %s1373_s24, %s1373_s24 }
  0x1b   :  { %p1270_p11 = scmp.ne.s32.totalorder %s1373_s24, %s1269_s20  ;;  %p1275_p13 = scmp.lt.s32.totalorder %s1269_s20, %s1269_s20 }
  0x1d   :  { %p1276_p0 = por %p1275_p13, %p1274_p12 }
  0x1f   :  { %p1277_p1 = pnand %p1276_p0, %p1270_p11 }
  0x21   :  { %1280 = shalt.err (!%p1277_p1)
}
  0x22   :  { %25 = dma.hbm_to_vmem [thread:$0]  %s1557_s0, 1024, %s1373_s24, [#allocation5], %s1333_s9, %s1333_s9, %s1334_s10  }
  0x23   :  { %s1335_s22 = smov [#allocation9]   ;;  %s1281_s27 = scalar_lea.hbm %s1560_s3, 1024 }
  0x24   :  { %s45_s23 = sshll.u32 %s1335_s22, 4  ;;  %p1282_p2 = scmp.ne.s32.totalorder %s1560_s3, %s1281_s27  ;;  %s46_s23 = int_to_ptr.vmem [resolvable:$true] %s45_s23 }
  0x25   :  { %p1285_p3 = scmp.lt.u32.totalorder %s1281_s27, %s1560_s3 }
  0x27   :  { %p1287_p4 = pnand %p1285_p3, %p1282_p2 }
  0x29   :  { %1290 = shalt.err (!%p1287_p4)
}
  0x2a   :  { %s1291_s8 = scalar_lea.vmem %s46_s23, 1024  ;;  %p1296_p6 = scmp.lt.s32.totalorder %s46_s23, %s46_s23 }
  0x2b   :  { %p1292_p5 = scmp.ne.s32.totalorder %s46_s23, %s1291_s8  ;;  %p1297_p7 = scmp.lt.s32.totalorder %s1291_s8, %s1291_s8 }
  0x2d   :  { %p1298_p8 = por %p1297_p7, %p1296_p6 }
  0x2f   :  { %p1299_p9 = pnand %p1298_p8, %p1292_p5 }
  0x31   :  { %1302 = shalt.err (!%p1299_p9)
}
  0x32   :  { %51 = dma.hbm_to_vmem [thread:$0]  %s1560_s3, 1024, %s46_s23, [#allocation8], %s1333_s9, %s1333_s9, %s1334_s10  }
  0x33   :  { %1325 = dma.done.wait [#allocation5], 1024  }
  0x34   :  { %1326 = vsyncadd [#allocation5], 4294966272 }
  0x35   :  { %1327 = dma.done.wait [#allocation8], 2048  }
  0x36   :  { %1328 = vsyncadd [#allocation8], 4294965248  ;;  %v1336_v0 = vmov 0   ;;  %v1197_v1 = vld [vmem:[#allocation7] sm:$0xff]   ;;  %v1198_v2 = vld [vmem:[#allocation7 + $0x8] sm:$0xff]  }
  0x37   :  { %1195 = vset.pattern.permute.xlu0 %v1336_v0  ;;  %1196 = vset.pattern.permute.xlu1 %v1336_v0  ;;  %v1199_v3 = vld [vmem:[#allocation7 + $0x10] sm:$0xff]   ;;  %v1200_v4 = vld [vmem:[#allocation7 + $0x18] sm:$0xff]   ;;  %v1205_v5 = vld [vmem:[#allocation4] sm:$0xff]  }
  0x38   :  { %1140 = vmatprep.subr.bf16.mxu0 %v1197_v1  ;;  %1156 = vmatprep.mubr.bf16.mxu0 %v1205_v5  ;;  %v1201_v6 = vld [vmem:[#allocation7 + $0x20] sm:$0xff]   ;;  %v1202_v7 = vld [vmem:[#allocation7 + $0x28] sm:$0xff]   ;;  %v384_v9 = vld [vmem:[%s1558_s1 + $0x30] sm:$0xff] }
  0x39   :  { %1141 = vmatpush3.bf16.msra.mxu0 %v1197_v1  ;;  %v382_v8 = vld [vmem:[%s1558_s1 + $0x20] sm:$0xff]  ;;  %426 = vperm.xlu1 %1196, %v384_v9   ;;  %v383_v10 = vld [vmem:[%s1558_s1 + $0x28] sm:$0xff]  ;;  %v385_v11 = vld [vmem:[%s1558_s1 + $0x38] sm:$0xff] }
  0x3a   :  { %1142 = vmatprep.subr.bf16.mxu0 %v1198_v2  ;;  %416 = vperm.xlu0 %1195, %v382_v8   ;;  %v1203_v12 = vld [vmem:[#allocation7 + $0x30] sm:$0xff]   ;;  %v386_v13 = vld [vmem:[%s1558_s1 + $0x40] sm:$0xff]  ;;  %v387_v14 = vld [vmem:[%s1558_s1 + $0x48] sm:$0xff] }
  0x3b   :  { %v1213_v15 = vld [vmem:[%s1561_s4 + $0x40] sm:$0xff]   ;;  %v1204_v16 = vld [vmem:[#allocation7 + $0x38] sm:$0xff]   ;;  %v388_v17 = vld [vmem:[%s1558_s1 + $0x50] sm:$0xff] }
  0x3c   :  { %v1214_v18 = vld [vmem:[%s1561_s4] sm:$0xff]   ;;  %1172 = vmatprep.subr.bf16.mxu1 %v1213_v15  ;;  %v1215_v19 = vld [vmem:[%s1561_s4 + $0x48] sm:$0xff]   ;;  %v389_v20 = vld [vmem:[%s1558_s1 + $0x58] sm:$0xff] }
  0x3d   :  { %1143 = vmatpush3.bf16.msra.mxu0 %v1198_v2  ;;  %431 = vperm.xlu1 %1196, %v385_v11   ;;  %v1206_v21 = vld [vmem:[#allocation4 + $0x8] sm:$0xff]   ;;  %v378_v22 = vld [vmem:[%s1558_s1] sm:$0xff]  ;;  %v1207_v25 = vld [vmem:[#allocation4 + $0x10] sm:$0xff]  }
  0x3e   :  { %1144 = vmatprep.subr.bf16.mxu0 %v1199_v3  ;;  %421 = vperm.xlu0 %1195, %v383_v10   ;;  %v379_v23 = vld [vmem:[%s1558_s1 + $0x8] sm:$0xff]  ;;  %v1217_v26 = vld [vmem:[%s1561_s4 + $0x50] sm:$0xff]   ;;  %v390_v27 = vld [vmem:[%s1558_s1 + $0x60] sm:$0xff] }
  0x3f   :  { %1180 = vmatpush3.bf16.msra.mxu1 %v1214_v18  ;;  %v1216_v24 = vld [vmem:[%s1561_s4 + $0x8] sm:$0xff]   ;;  %v1218_v29 = vld [vmem:[%s1561_s4 + $0x10] sm:$0xff]   ;;  %v1219_v30 = vld [vmem:[%s1561_s4 + $0x58] sm:$0xff]  }
  0x40   :  { %1173 = vmatprep.subr.bf16.mxu1 %v1215_v19  ;;  %v391_v28 = vld [vmem:[%s1558_s1 + $0x68] sm:$0xff]  ;;  %v1208_v31 = vld [vmem:[#allocation4 + $0x18] sm:$0xff]   ;;  %v380_v32 = vld [vmem:[%s1558_s1 + $0x10] sm:$0xff] }
  0x41   :  { %1145 = vmatpush3.bf16.msra.mxu0 %v1199_v3  ;;  %441 = vperm.xlu1 %1196, %v387_v14   ;;  %v381_v33 = vld [vmem:[%s1558_s1 + $0x18] sm:$0xff]  ;;  %v1221_v35 = vld [vmem:[%s1561_s4 + $0x60] sm:$0xff]   ;;  %v392_v38 = vld [vmem:[%s1558_s1 + $0x70] sm:$0xff] }
  0x42   :  { %1146 = vmatprep.subr.bf16.mxu0 %v1200_v4  ;;  %436 = vperm.xlu0 %1195, %v386_v13   ;;  %v1220_v34 = vld [vmem:[%s1561_s4 + $0x18] sm:$0xff]   ;;  %v1209_v36 = vld [vmem:[#allocation4 + $0x20] sm:$0xff]   ;;  %v1223_v40 = vld [vmem:[%s1561_s4 + $0x68] sm:$0xff]  }
  0x43   :  { %1181 = vmatpush3.bf16.msra.mxu1 %v1216_v24  ;;  %v1222_v37 = vld [vmem:[%s1561_s4 + $0x20] sm:$0xff]   ;;  %v393_v39 = vld [vmem:[%s1558_s1 + $0x78] sm:$0xff]  ;;  %v1224_v41 = vld [vmem:[%s1561_s4 + $0x28] sm:$0xff]  }
  0x44   :  { %1174 = vmatprep.subr.bf16.mxu1 %v1217_v26  ;;  %v1210_v42 = vld [vmem:[#allocation4 + $0x28] sm:$0xff]   ;;  %v1211_v43 = vld [vmem:[#allocation4 + $0x30] sm:$0xff]   ;;  %v1212_v44 = vld [vmem:[#allocation4 + $0x38] sm:$0xff]  }
  0x45   :  { %1147 = vmatpush3.bf16.msra.mxu0 %v1200_v4  ;;  %451 = vperm.xlu1 %1196, %v389_v20   ;;  %v1225_v45 = vld [vmem:[%s1561_s4 + $0x70] sm:$0xff]   ;;  %v1227_v47 = vld [vmem:[%s1561_s4 + $0x78] sm:$0xff]   ;;  %v1229_v49 = vld [vmem:[#allocation9] sm:$0xff]  }
  0x46   :  { %1148 = vmatprep.subr.bf16.mxu0 %v1201_v6  ;;  %446 = vperm.xlu0 %1195, %v388_v17   ;;  %v1226_v46 = vld [vmem:[%s1561_s4 + $0x30] sm:$0xff]   ;;  %v1228_v48 = vld [vmem:[%s1561_s4 + $0x38] sm:$0xff]   ;;  %v1231_v10 = vld [vmem:[#allocation9 + $0x8] sm:$0xff]  }
  0x47   :  { %1182 = vmatpush3.bf16.msra.mxu1 %v1218_v29  ;;  %v1230_v50 = vld [vmem:[#allocation9 + $0x10] sm:$0xff]  }
  0x48   :  { %1175 = vmatprep.subr.bf16.mxu1 %v1219_v30  ;;  %777 = vmatprep.mubr.bf16.mxu1 %v1230_v50  ;;  %v1524_v50 = vld [vmem:[%s1562_s5] ss:$0 sm:$0xff]  ;;  %s1337_s5 = smov [#allocation10]  }
  0x49   :  { %1149 = vmatpush3.bf16.msra.mxu0 %v1201_v6  ;;  %401 = vperm.xlu1 %1196, %v379_v23   ;;  %s927_s23 = sshll.u32 %s1337_s5, 4  ;;  %s928_s23 = int_to_ptr.vmem [resolvable:$true] %s927_s23 }
  0x4a   :  { %1150 = vmatprep.subr.bf16.mxu0 %v1202_v7  ;;  %396 = vperm.xlu0 %1195, %v378_v22   ;;  %s1303_s25 = scalar_lea.vmem %s928_s23, 1024  ;;  %p1308_p11 = scmp.lt.s32.totalorder %s928_s23, %s928_s23 }
  0x4b   :  { %1183 = vmatpush3.bf16.msra.mxu1 %v1220_v34  ;;  %p1304_p10 = scmp.ne.s32.totalorder %s928_s23, %s1303_s25  ;;  %p1309_p12 = scmp.lt.s32.totalorder %s1303_s25, %s1303_s25 }
  0x4c   :  { %1176 = vmatprep.subr.bf16.mxu1 %v1221_v35 }
  0x4d   :  { %1151 = vmatpush3.bf16.msra.mxu0 %v1202_v7  ;;  %461 = vperm.xlu1 %1196, %v391_v28   ;;  %p1310_p13 = por %p1309_p12, %p1308_p11 }
  0x4e   :  { %1152 = vmatprep.subr.bf16.mxu0 %v1203_v12  ;;  %456 = vperm.xlu0 %1195, %v390_v27  }
  0x4f   :  { %1184 = vmatpush3.bf16.msra.mxu1 %v1222_v37  ;;  %p1311_p0 = pnand %p1310_p13, %p1304_p10 }
  0x50   :  { %1177 = vmatprep.subr.bf16.mxu1 %v1223_v40 }
  0x51   :  { %1153 = vmatpush3.bf16.msra.mxu0 %v1203_v12  ;;  %411 = vperm.xlu1 %1196, %v381_v33  }
  0x52   :  { %1154 = vmatprep.subr.bf16.mxu0 %v1204_v16  ;;  %406 = vperm.xlu0 %1195, %v380_v32   ;;  %v1233_v32 = vld [vmem:[#allocation9 + $0x20] sm:$0xff]  }
  0x53   :  { %1185 = vmatpush3.bf16.msra.mxu1 %v1224_v41 }
  0x54   :  { %1178 = vmatprep.subr.bf16.mxu1 %v1225_v45 }
  0x55   :  { %1155 = vmatpush3.bf16.msra.mxu0 %v1204_v16  ;;  %471 = vperm.xlu1 %1196, %v393_v39  }
  0x56   :  { %1076 = vmatprep.subr.bf16.mxu0 %v1213_v15  ;;  %466 = vperm.xlu0 %1195, %v392_v38  }
  0x57   :  { %1186 = vmatpush3.bf16.msra.mxu1 %v1226_v46 }
  0x58   :  { %1157 = vmatmul.mubr.bf16.vlgmr.msra.gmra.mrb[0].mxu0 %v1206_v21  ;;  %1179 = vmatprep.subr.bf16.mxu1 %v1227_v47  ;;  %v1232_v21 = vld [vmem:[#allocation9 + $0x18] sm:$0xff]  }
  0x59   :  { %1160 = vmatprep.mubr.bf16.mxu0 %v1207_v25  ;;  %1077 = vmatpush3.bf16.msra.mxu0 %v1214_v18 }
  0x5a   :  { %1078 = vmatprep.subr.bf16.mxu0 %v1215_v19 }
  0x5b   :  { %1187 = vmatpush3.bf16.msra.mxu1 %v1228_v48 }
  0x5d   :  { %1079 = vmatpush3.bf16.msra.mxu0 %v1216_v24 }
  0x5e   :  { %1080 = vmatprep.subr.bf16.mxu0 %v1217_v26 }
  0x60   :  { %1161 = vmatmul.mubr.bf16.gmra.mrb[4].mxu0 %v1208_v31 }
  0x61   :  { %1164 = vmatprep.mubr.bf16.mxu0 %v1209_v36  ;;  %1081 = vmatpush3.bf16.msra.mxu0 %v1218_v29 }
  0x62   :  { %1082 = vmatprep.subr.bf16.mxu0 %v1219_v30 }
  0x65   :  { %1083 = vmatpush3.bf16.msra.mxu0 %v1220_v34 }
  0x66   :  { %1084 = vmatprep.subr.bf16.mxu0 %v1221_v35 }
  0x68   :  { %1165 = vmatmul.mubr.bf16.gmra.mrb[8].mxu0 %v1210_v42 }
  0x69   :  { %1168 = vmatprep.mubr.bf16.mxu0 %v1211_v43  ;;  %1085 = vmatpush3.bf16.msra.mxu0 %v1222_v37 }
  0x6a   :  { %1086 = vmatprep.subr.bf16.mxu0 %v1223_v40 }
  0x6d   :  { %1087 = vmatpush3.bf16.msra.mxu0 %v1224_v41 }
  0x6e   :  { %1088 = vmatprep.subr.bf16.mxu0 %v1225_v45  ;;  %v1234_v45 = vld [vmem:[#allocation9 + $0x28] sm:$0xff]  }
  0x70   :  { %1169 = vmatmul.mubr.bf16.gmra.mrb[12].mxu0 %v1212_v44 }
  0x71   :  { %1089 = vmatpush3.bf16.msra.mxu0 %v1226_v46  ;;  %761 = vmatprep.mubr.bf16.mxu0 %v1229_v49 }
  0x72   :  { %1090 = vmatprep.subr.bf16.mxu0 %v1227_v47  ;;  %v1235_v47 = vld [vmem:[#allocation9 + $0x30] sm:$0xff]  }
  0x75   :  { %1091 = vmatpush3.bf16.msra.mxu0 %v1228_v48  ;;  %v1236_v48 = vld [vmem:[#allocation9 + $0x38] sm:$0xff]  }
  0xb8   :  { %v427_v52 = vpop.permute.xlu1 %426 }
  0xb9   :  { %v417_v51 = vpop.permute.xlu0 %416 }
  0xbc   :  { %v432_v54 = vpop.permute.xlu1 %431 }
  0xbd   :  { %v422_v53 = vpop.permute.xlu0 %421 }
  0xc0   :  { %v442_v56 = vpop.permute.xlu1 %441 }
  0xc1   :  { %v437_v55 = vpop.permute.xlu0 %436 }
  0xc4   :  { %v452_v58 = vpop.permute.xlu1 %451 }
  0xc5   :  { %v447_v57 = vpop.permute.xlu0 %446 }
  0xc8   :  { %v402_v60 = vpop.permute.xlu1 %401 }
  0xc9   :  { %v397_v59 = vpop.permute.xlu0 %396 }
  0xcc   :  { %v462_v62 = vpop.permute.xlu1 %461 }
  0xcd   :  { %v457_v61 = vpop.permute.xlu0 %456 }
  0xd0   :  { %v412_v1 = vpop.permute.xlu1 %411 }
  0xd1   :  { %v407_v63 = vpop.permute.xlu0 %406 }
  0xd4   :  { %v472_v37 = vpop.permute.xlu1 %471 }
  0xd5   :  { %v467_v35 = vpop.permute.xlu0 %466 }
 0x12b   :  { %v1158_v0 = vpop.f32.mrb[0].mxu0 }
 0x12c   :  { %v264_v2 = vpop.f32.mrb[1].mxu0  ;;  %v476_v4 = vmul.f32 %v1158_v0, %v407_v63 }
 0x12d   :  { %v1159_v3 = vpop.f32.mrb[2].mxu0  ;;  %v474_v7 = vmul.f32 %v397_v59, %v264_v2 }
 0x12e   :  { %v477_v5 = vmul.f32 %v1159_v3, %v412_v1  ;;  %v267_v6 = vpop.f32.mrb[3].mxu0 }
 0x12f   :  { %v475_v8 = vmul.f32 %v402_v60, %v267_v6 }
 0x130   :  { %v491_v9 = vpack.c.bf16 %v477_v5, %v476_v4 }
 0x131   :  { %v490_v11 = vpack.c.bf16 %v475_v8, %v474_v7 }
 0x133   :  { %v1162_v12 = vpop.f32.mrb[4].mxu0  ;;  %762 = vmatmul.mubr.bf16.vlgmr.msra.gmra.mrb[16].mxu0 %v490_v11 }
 0x134   :  { %v280_v13 = vpop.f32.mrb[5].mxu0  ;;  %769 = vmatprep.mubr.bf16.mxu0 %v1231_v10  ;;  %v480_v15 = vmul.f32 %v1162_v12, %v427_v52 }
 0x135   :  { %v1163_v14 = vpop.f32.mrb[6].mxu0  ;;  %v478_v18 = vmul.f32 %v417_v51, %v280_v13 }
 0x136   :  { %v481_v16 = vmul.f32 %v1163_v14, %v432_v54  ;;  %v283_v17 = vpop.f32.mrb[7].mxu0 }
 0x137   :  { %v479_v19 = vmul.f32 %v422_v53, %v283_v17 }
 0x138   :  { %v493_v20 = vpack.c.bf16 %v481_v16, %v480_v15 }
 0x139   :  { %v492_v22 = vpack.c.bf16 %v479_v19, %v478_v18 }
 0x13b   :  { %v1166_v23 = vpop.f32.mrb[8].mxu0  ;;  %770 = vmatmul.mubr.bf16.gmra.mrb[20].mxu0 %v491_v9  ;;  %778 = vmatmul.mubr.bf16.vlgmr.msra.gmra.mrb[0].mxu1 %v492_v22 }
 0x13c   :  { %v296_v24 = vpop.f32.mrb[9].mxu0  ;;  %785 = vmatprep.mubr.bf16.mxu1 %v1232_v21  ;;  %v484_v26 = vmul.f32 %v1166_v23, %v447_v57 }
 0x13d   :  { %v1167_v25 = vpop.f32.mrb[10].mxu0  ;;  %v482_v29 = vmul.f32 %v437_v55, %v296_v24 }
 0x13e   :  { %v485_v27 = vmul.f32 %v1167_v25, %v452_v58  ;;  %v299_v28 = vpop.f32.mrb[11].mxu0 }
 0x13f   :  { %v483_v30 = vmul.f32 %v442_v56, %v299_v28 }
 0x140   :  { %v495_v31 = vpack.c.bf16 %v485_v27, %v484_v26 }
 0x141   :  { %v494_v33 = vpack.c.bf16 %v483_v30, %v482_v29 }
 0x143   :  { %v1170_v34 = vpop.f32.mrb[12].mxu0  ;;  %786 = vmatmul.mubr.bf16.gmra.mrb[4].mxu1 %v493_v20 }
 0x144   :  { %v312_v36 = vpop.f32.mrb[13].mxu0  ;;  %793 = vmatprep.mubr.bf16.mxu1 %v1233_v32  ;;  %v488_v39 = vmul.f32 %v1170_v34, %v467_v35 }
 0x145   :  { %v1171_v38 = vpop.f32.mrb[14].mxu0  ;;  %v486_v42 = vmul.f32 %v457_v61, %v312_v36 }
 0x146   :  { %v489_v40 = vmul.f32 %v1171_v38, %v472_v37  ;;  %v315_v41 = vpop.f32.mrb[15].mxu0 }
 0x147   :  { %v487_v43 = vmul.f32 %v462_v62, %v315_v41 }
 0x148   :  { %v497_v44 = vpack.c.bf16 %v489_v40, %v488_v39 }
 0x149   :  { %v496_v46 = vpack.c.bf16 %v487_v43, %v486_v42 }
 0x14b   :  { %794 = vmatmul.mubr.bf16.gmra.mrb[8].mxu1 %v494_v33 }
 0x14c   :  { %801 = vmatprep.mubr.bf16.mxu1 %v1234_v45 }
 0x153   :  { %802 = vmatmul.mubr.bf16.gmra.mrb[12].mxu1 %v495_v31 }
 0x154   :  { %809 = vmatprep.mubr.bf16.mxu1 %v1235_v47 }
 0x15b   :  { %810 = vmatmul.mubr.bf16.gmra.mrb[16].mxu1 %v496_v46 }
 0x15c   :  { %817 = vmatprep.mubr.bf16.mxu1 %v1236_v48 }
 0x163   :  { %818 = vmatmul.mubr.bf16.gmra.mrb[20].mxu1 %v497_v44 }
 0x206   :  { %v1092_v49 = vpop.f32.mrb[16].mxu0 }
 0x207   :  { %v1093_v51 = vpop.f32.mrb[17].mxu0 }
 0x208   :  { %v1094_v52 = vadd.f32 %v1093_v51, %v1092_v49  ;;  %v1095_v53 = vpop.f32.mrb[18].mxu0 }
 0x209   :  { %v1096_v54 = vpop.f32.mrb[19].mxu0 }
 0x20a   :  { %v764_v55 = vadd.f32 %v1094_v52, %v1524_v50  ;;  %v1097_v56 = vadd.f32 %v1096_v54, %v1095_v53 }
 0x20c   :  { %v767_v57 = vadd.f32 %v1097_v56, %v1524_v50  ;;  %v826_v58 = vmax.f32 %v764_v55, 0.0 }
 0x20e   :  { %v827_v59 = vmax.f32 %v767_v57, 0.0  ;;  %v1098_v60 = vpop.f32.mrb[20].mxu0  ;;  %v1104_v61 = vpop.f32.mrb[0].mxu1 }
 0x20f   :  { %v1099_v62 = vpop.f32.mrb[21].mxu0  ;;  %v1105_v63 = vpop.f32.mrb[1].mxu1 }
 0x210   :  { %v1016_v0 = vpack.c.bf16 %v827_v59, %v826_v58  ;;  %v1100_v1 = vadd.f32 %v1099_v62, %v1098_v60  ;;  %v1106_v2 = vadd.f32 %v1105_v63, %v1104_v61  ;;  %v1101_v3 = vpop.f32.mrb[22].mxu0  ;;  %v1107_v4 = vpop.f32.mrb[2].mxu1 }
 0x211   :  { %v1102_v5 = vpop.f32.mrb[23].mxu0  ;;  %v1108_v6 = vpop.f32.mrb[3].mxu1 }
 0x212   :  { %1017 = vst [vmem:[#allocation10] sm:$0xff] %v1016_v0   ;;  %v772_v7 = vadd.f32 %v1100_v1, %v1524_v50  ;;  %v780_v8 = vadd.f32 %v1106_v2, %v1524_v50  ;;  %v1103_v9 = vadd.f32 %v1102_v5, %v1101_v3  ;;  %v1109_v10 = vadd.f32 %v1108_v6, %v1107_v4 }
 0x214   :  { %v775_v11 = vadd.f32 %v1103_v9, %v1524_v50  ;;  %v783_v12 = vadd.f32 %v1109_v10, %v1524_v50  ;;  %v828_v13 = vmax.f32 %v772_v7, 0.0  ;;  %v830_v14 = vmax.f32 %v780_v8, 0.0 }
 0x216   :  { %v829_v15 = vmax.f32 %v775_v11, 0.0  ;;  %v831_v16 = vmax.f32 %v783_v12, 0.0  ;;  %v1110_v17 = vpop.f32.mrb[4].mxu1 }
 0x217   :  { %v1111_v18 = vpop.f32.mrb[5].mxu1 }
 0x218   :  { %v1021_v19 = vpack.c.bf16 %v829_v15, %v828_v13  ;;  %v1026_v20 = vpack.c.bf16 %v831_v16, %v830_v14  ;;  %v1112_v21 = vadd.f32 %v1111_v18, %v1110_v17  ;;  %v1113_v22 = vpop.f32.mrb[6].mxu1 }
 0x219   :  { %v1114_v23 = vpop.f32.mrb[7].mxu1 }
 0x21a   :  { %1053 = vst [vmem:[#allocation10 + $0x8] sm:$0xff] %v1021_v19   ;;  %1054 = vst [vmem:[#allocation10 + $0x10] sm:$0xff] %v1026_v20   ;;  %v788_v24 = vadd.f32 %v1112_v21, %v1524_v50  ;;  %v1115_v25 = vadd.f32 %v1114_v23, %v1113_v22 }
 0x21c   :  { %v791_v26 = vadd.f32 %v1115_v25, %v1524_v50  ;;  %v832_v27 = vmax.f32 %v788_v24, 0.0 }
 0x21e   :  { %v833_v28 = vmax.f32 %v791_v26, 0.0  ;;  %v1116_v29 = vpop.f32.mrb[8].mxu1 }
 0x21f   :  { %v1117_v30 = vpop.f32.mrb[9].mxu1 }
 0x220   :  { %v1031_v31 = vpack.c.bf16 %v833_v28, %v832_v27  ;;  %v1118_v32 = vadd.f32 %v1117_v30, %v1116_v29  ;;  %v1119_v33 = vpop.f32.mrb[10].mxu1 }
 0x221   :  { %v1120_v34 = vpop.f32.mrb[11].mxu1 }
 0x222   :  { %1055 = vst [vmem:[#allocation10 + $0x18] sm:$0xff] %v1031_v31   ;;  %v796_v35 = vadd.f32 %v1118_v32, %v1524_v50  ;;  %v1121_v36 = vadd.f32 %v1120_v34, %v1119_v33 }
 0x224   :  { %v799_v37 = vadd.f32 %v1121_v36, %v1524_v50  ;;  %v834_v38 = vmax.f32 %v796_v35, 0.0 }
 0x226   :  { %v835_v39 = vmax.f32 %v799_v37, 0.0  ;;  %v1122_v40 = vpop.f32.mrb[12].mxu1 }
 0x227   :  { %v1123_v41 = vpop.f32.mrb[13].mxu1 }
 0x228   :  { %v1036_v42 = vpack.c.bf16 %v835_v39, %v834_v38  ;;  %v1124_v43 = vadd.f32 %v1123_v41, %v1122_v40  ;;  %v1125_v44 = vpop.f32.mrb[14].mxu1 }
 0x229   :  { %v1126_v45 = vpop.f32.mrb[15].mxu1 }
 0x22a   :  { %1056 = vst [vmem:[#allocation10 + $0x20] sm:$0xff] %v1036_v42   ;;  %v804_v46 = vadd.f32 %v1124_v43, %v1524_v50  ;;  %v1127_v47 = vadd.f32 %v1126_v45, %v1125_v44 }
 0x22c   :  { %v807_v48 = vadd.f32 %v1127_v47, %v1524_v50  ;;  %v836_v49 = vmax.f32 %v804_v46, 0.0 }
 0x22e   :  { %v837_v51 = vmax.f32 %v807_v48, 0.0  ;;  %v1128_v52 = vpop.f32.mrb[16].mxu1 }
 0x22f   :  { %v1129_v53 = vpop.f32.mrb[17].mxu1 }
 0x230   :  { %v1041_v54 = vpack.c.bf16 %v837_v51, %v836_v49  ;;  %v1130_v55 = vadd.f32 %v1129_v53, %v1128_v52  ;;  %v1131_v56 = vpop.f32.mrb[18].mxu1 }
 0x231   :  { %v1132_v57 = vpop.f32.mrb[19].mxu1 }
 0x232   :  { %1057 = vst [vmem:[#allocation10 + $0x28] sm:$0xff] %v1041_v54   ;;  %v812_v58 = vadd.f32 %v1130_v55, %v1524_v50  ;;  %v1133_v59 = vadd.f32 %v1132_v57, %v1131_v56 }
 0x234   :  { %v815_v60 = vadd.f32 %v1133_v59, %v1524_v50  ;;  %v838_v61 = vmax.f32 %v812_v58, 0.0 }
 0x236   :  { %v839_v62 = vmax.f32 %v815_v60, 0.0  ;;  %v1134_v63 = vpop.f32.mrb[20].mxu1 }
 0x237   :  { %v1135_v0 = vpop.f32.mrb[21].mxu1 }
 0x238   :  { %v1046_v1 = vpack.c.bf16 %v839_v62, %v838_v61  ;;  %v1136_v2 = vadd.f32 %v1135_v0, %v1134_v63  ;;  %v1137_v3 = vpop.f32.mrb[22].mxu1 }
 0x239   :  { %v1138_v4 = vpop.f32.mrb[23].mxu1 }
 0x23a   :  { %1058 = vst [vmem:[#allocation10 + $0x30] sm:$0xff] %v1046_v1   ;;  %v820_v5 = vadd.f32 %v1136_v2, %v1524_v50  ;;  %v1139_v6 = vadd.f32 %v1138_v4, %v1137_v3 }
 0x23c   :  { %v823_v7 = vadd.f32 %v1139_v6, %v1524_v50  ;;  %v840_v8 = vmax.f32 %v820_v5, 0.0 }
 0x23e   :  { %v841_v9 = vmax.f32 %v823_v7, 0.0 }
 0x240   :  { %v1051_v10 = vpack.c.bf16 %v841_v9, %v840_v8 }
 0x242   :  { %1059 = vst [vmem:[#allocation10 + $0x38] sm:$0xff] %v1051_v10  }
 0x243   :  { %1314 = shalt.err (!%p1311_p0)
}
 0x244   :  { %s1315_s28 = scalar_lea.hbm %s1563_s6, 1024 }
 0x245   :  { %p1316_p1 = scmp.ne.s32.totalorder %s1563_s6, %s1315_s28  ;;  %p1319_p2 = scmp.lt.u32.totalorder %s1315_s28, %s1563_s6 }
 0x247   :  { %p1321_p3 = pnand %p1319_p2, %p1316_p1 }
 0x249   :  { %1324 = shalt.err (!%p1321_p3)
}
 0x24a   :  { %933 = dma.vmem_to_hbm [thread:$0]  %s928_s23, 1024, %s1563_s6, [#allocation6], %s1333_s9, %s1333_s9, %s1334_s10  }
 0x24b   :  { %1329 = dma.done.wait [#allocation6], 1024  }
 0x24c   :  { %1330 = vsyncadd [#allocation6], 4294966272 }
 0x24d   :  { %937 = vsyncpa [#allocation5], 1 }
 0x24e   :  { %938 = vsyncpa [#allocation8], 1 }
 0x24f   :  { %939 = vsyncpa [#allocation6], 1 }

</bundles_post_ra>
